<compile_context>
chip_gen: v6e
topology: v6e:2x2x1
jax: 0.10.0
libtpu: 0.0.40
codegen_flags: <defaults>
</compile_context>

<pallas_src>
import jax
import jax.numpy as jnp
from jax.experimental import pallas as pl
from jax.experimental.pallas import tpu as pltpu

KERNEL_SIZE = 7
PAD = KERNEL_SIZE // 2

# Below this many elements the Pallas launch overhead dominates; use plain jnp.
_PALLAS_MIN_ELEMENTS = 16 * 1024


def _vmem_capacity_bytes():
    """Per-core VMEM capacity (generation-aware); conservative fallback = v7x."""
    try:
        info = pltpu.get_tpu_info()
        cap = getattr(info, "vmem_capacity_bytes", None)
        if cap:
            return int(cap)
    except Exception:
        pass
    return 64 * 1024 * 1024


def _circular_shift(x, shift):
    """result[..., i] = x[..., (i - shift) % L]  (== jnp.roll along last axis)."""
    L = x.shape[-1]
    s = shift % L
    if s == 0:
        return x
    if L % 128 == 0:
        # Lane rotation on the XLU: does not consume vld/vst or VALU slots,
        # leaving them for the real HBM stream (the kernel is memory-bound).
        return pltpu.roll(x, shift=s, axis=x.ndim - 1)
    # Small / lane-unaligned L: two-slice concat (cheap at these sizes).
    return jnp.concatenate([x[:, L - s:], x[:, :L - s]], axis=-1)


def conv1d_reflect_kernel(x_ref, w_ref, b_ref, out_ref):
    """x_ref: (TN, L) VMEM tile (native dtype), w_ref: (7,) f32 SMEM,
    b_ref: (1,) f32 SMEM, out_ref: (TN, L) VMEM tile (native dtype)."""
    L = out_ref.shape[1]
    x = x_ref[...].astype(jnp.float32)  # accumulate in f32 (v5e: no bf16 VPU)

    # Hoist the 7 SMEM weight reads and the bias: once per grid step.
    w = [w_ref[k] for k in range(KERNEL_SIZE)]
    b0 = b_ref[0]

    # Circular taps: tap_k[i] = x[(i + k - PAD) % L].  The center tap (k==PAD)
    # is x itself, so fold it plus the bias into the accumulator init.
    acc = w[PAD] * x + b0
    for k in range(KERNEL_SIZE):
        if k == PAD:
            continue
        acc = acc + w[k] * _circular_shift(x, PAD - k)

    out_ref[...] = acc.astype(out_ref.dtype)

    # Reflect-boundary fixup: only the first/last PAD output columns can have
    # wrapped taps; overwrite them with directly-computed reflect values.
    left_cols = range(PAD)
    right_cols = range(max(L - PAD, PAD), L)
    for i in sorted(set(list(left_cols) + list(right_cols))):
        v = b0
        for k in range(KERNEL_SIZE):
            idx = i + k - PAD
            if idx < 0:
                idx = -idx                    # left reflect:  x[-j]  -> x[j]
            elif idx >= L:
                idx = 2 * L - 2 - idx         # right reflect: x[L-1+j] -> x[L-1-j]
            v = v + w[k] * x[:, idx:idx + 1]
        out_ref[:, i:i + 1] = v.astype(out_ref.dtype)


def _choose_row_tile(N, L, in_itemsize):
    """Row tile: multiple of 8 sublanes, sized from the chip's VMEM capacity,
    and capped so the row grid has >= 2 steps when N >= 16 (v7x megacore)."""
    if N <= 8:
        return N
    cap = _vmem_capacity_bytes()
    # ~8 MiB input tile on v5e/v6e (128 MiB VMEM), ~4 MiB on v7x (64 MiB VMEM).
    tile_budget = max(cap // 16, 2 * 1024 * 1024)
    bytes_per_row = max(L * in_itemsize, 1)
    tn = tile_budget // bytes_per_row
    tn = max(8, (tn // 8) * 8)
    if N >= 16:
        # Guarantee >= 2 grid steps so ("parallel",) uses both TensorCores.
        tn = min(tn, max(8, ((N // 2) // 8) * 8))
    return int(min(tn, N))


def _vmem_limit_bytes(tn, L, in_itemsize, out_itemsize):
    """Scoped-VMEM request: double-buffered in/out blocks + f32 temporaries,
    clamped below the chip's physical capacity (v7x aware)."""
    cap = _vmem_capacity_bytes()
    io = tn * L * (in_itemsize + out_itemsize)   # one in block + one out block
    temps = 3 * tn * L * 4                       # f32 x / rolled tap / acc
    need = 2 * io + temps + (8 << 20)            # double-buffering + slack
    return int(min(max(need, 32 << 20), int(0.7 * cap)))


def _conv1d_reflect_jnp(x2, w, b):
    """Pure-jnp reference / small-shape fallback. x2: (N, L), w: (7,), b: (1,)."""
    L = x2.shape[1]
    xf = x2.astype(jnp.float32)
    xpad = jnp.pad(xf, ((0, 0), (PAD, PAD)), mode="reflect")
    out = jnp.full_like(xf, b[0])
    for k in range(KERNEL_SIZE):
        out = out + w[k] * xpad[:, k:k + L]
    return out.astype(x2.dtype)


def _conv1d_reflect_pallas(x2, w, b, block_rows=None):
    N, L = x2.shape
    out_dtype = x2.dtype
    in_itemsize = x2.dtype.itemsize
    out_itemsize = jnp.dtype(out_dtype).itemsize

    if block_rows is not None:
        tn = int(block_rows)
        if 8 < tn < N and tn % 8 != 0:
            tn = max(8, (tn // 8) * 8)    # keep user tiles sublane-aligned
        tn = max(1, tn)
    else:
        tn = _choose_row_tile(N, L, in_itemsize)
    tn = min(tn, N)
    grid = (pl.cdiv(N, tn),)

    return pl.pallas_call(
        conv1d_reflect_kernel,
        out_shape=jax.ShapeDtypeStruct((N, L), out_dtype),
        grid=grid,
        in_specs=[
            pl.BlockSpec((tn, L), lambda i: (i, 0)),                 # row tile
            pl.BlockSpec(memory_space=pltpu.MemorySpace.SMEM),       # weights
            pl.BlockSpec(memory_space=pltpu.MemorySpace.SMEM),       # bias
        ],
        out_specs=pl.BlockSpec((tn, L), lambda i: (i, 0)),
        compiler_params=pltpu.CompilerParams(
            dimension_semantics=("parallel",),   # shard rows across TCs (v7x)
            vmem_limit_bytes=_vmem_limit_bytes(tn, L, in_itemsize, out_itemsize),
        ),
    )(x2, w, b)


def first_1_net_forward(x, weight, bias, *, force_pallas=False, block_rows=None):
    """x: (N, 1, L), weight: (1, 1, 7), bias: (1,). Returns (N, 1, L) in the
    input dtype, matching the PyTorch module's forward (Conv1d, reflect pad)."""
    N, C, L = x.shape
    assert C == 1, "first_1_net has in_channels=1"
    assert L >= PAD + 1, "reflect padding requires L >= kernel_size//2 + 1 (= 4)"

    x2 = x[:, 0, :]                                       # native dtype, no up-cast
    w = weight.reshape(KERNEL_SIZE).astype(jnp.float32)   # (7,)
    b = bias.reshape(1).astype(jnp.float32)               # (1,)

    if not force_pallas and N * L < _PALLAS_MIN_ELEMENTS:
        out = _conv1d_reflect_jnp(x2, w, b)
    else:
        out = _conv1d_reflect_pallas(x2, w, b, block_rows=block_rows)

    return out[:, None, :]                                # (N, 1, L)


if __name__ == "__main__":
    key = jax.random.PRNGKey(0)
    kx1, kx2, kw, kb = jax.random.split(key, 4)

    # Conv1d default init: uniform(-1/sqrt(fan_in), 1/sqrt(fan_in)), fan_in = 1*7.
    fan_in = 1 * KERNEL_SIZE
    bound = 1.0 / (fan_in ** 0.5)
    weight = jax.random.uniform(kw, (1, 1, KERNEL_SIZE), jnp.float32, -bound, bound)
    bias = jax.random.uniform(kb, (1,), jnp.float32, -bound, bound)

    # Case 1: small module-consistent shape (single full-array block, concat taps).
    N1, L1 = 2, 16
    x1 = jax.random.normal(kx1, (N1, 1, L1), dtype=jnp.float32)
    y1 = first_1_net_forward(x1, weight, bias, force_pallas=True)
    jax.block_until_ready(y1)
    ref1 = _conv1d_reflect_jnp(x1[:, 0, :], weight.reshape(-1), bias)[:, None, :]
    assert y1.shape == (N1, 1, L1) and y1.dtype == jnp.float32
    assert jnp.allclose(y1, ref1, atol=1e-5, rtol=1e-5)

    # Case 2: tiled, pipelined grid path with lane-aligned L (pltpu.roll taps).
    N2, L2 = 32, 128
    x2 = jax.random.normal(kx2, (N2, 1, L2), dtype=jnp.float32)
    y2 = first_1_net_forward(x2, weight, bias, force_pallas=True, block_rows=8)
    jax.block_until_ready(y2)
    ref2 = _conv1d_reflect_jnp(x2[:, 0, :], weight.reshape(-1), bias)[:, None, :]
    assert y2.shape == (N2, 1, L2)
    assert jnp.allclose(y2, ref2, atol=1e-5, rtol=1e-5)

    print("KERNEL_OK")
</pallas_src>

<mosaic_0001>
module attributes {stable_mosaic.version = 11 : i64} {
  func.func @conv1d_reflect_kernel(%arg0: i32, %arg1: memref<2x16xf32, #tpu.memory_space<vmem>>, %arg2: memref<7xf32, #tpu.memory_space<smem>>, %arg3: memref<1xf32, #tpu.memory_space<smem>>, %arg4: memref<2x16xf32, #tpu.memory_space<vmem>>) attributes {dimension_semantics = [#tpu.dimension_semantics<parallel>], iteration_bounds = array<i64: 1>, scalar_prefetch = 0 : i64, scratch_operands = 0 : i64, tpu.core_type = #tpu.core_type<tc>, window_params = [{transform_indices = @transform_0, window_bounds = array<i64: 2, 16>}, {transform_indices = @transform_1, window_bounds = array<i64: 7>}, {transform_indices = @transform_2, window_bounds = array<i64: 1>}, {transform_indices = @transform_3, window_bounds = array<i64: 2, 16>}]} {
    %c0 = arith.constant 0 : index
    %c0_0 = arith.constant 0 : index
    %0 = vector.load %arg1[%c0, %c0_0] : memref<2x16xf32, #tpu.memory_space<vmem>>, vector<2x16xf32>
    %c0_1 = arith.constant 0 : index
    %1 = memref.load %arg2[%c0_1] : memref<7xf32, #tpu.memory_space<smem>>
    %c1 = arith.constant 1 : index
    %2 = memref.load %arg2[%c1] : memref<7xf32, #tpu.memory_space<smem>>
    %c2 = arith.constant 2 : index
    %3 = memref.load %arg2[%c2] : memref<7xf32, #tpu.memory_space<smem>>
    %c3 = arith.constant 3 : index
    %4 = memref.load %arg2[%c3] : memref<7xf32, #tpu.memory_space<smem>>
    %c4 = arith.constant 4 : index
    %5 = memref.load %arg2[%c4] : memref<7xf32, #tpu.memory_space<smem>>
    %c5 = arith.constant 5 : index
    %6 = memref.load %arg2[%c5] : memref<7xf32, #tpu.memory_space<smem>>
    %c6 = arith.constant 6 : index
    %7 = memref.load %arg2[%c6] : memref<7xf32, #tpu.memory_space<smem>>
    %c0_2 = arith.constant 0 : index
    %8 = memref.load %arg3[%c0_2] : memref<1xf32, #tpu.memory_space<smem>>
    %9 = vector.broadcast %4 : f32 to vector<2x16xf32>
    %10 = arith.mulf %9, %0 : vector<2x16xf32>
    %11 = vector.broadcast %8 : f32 to vector<2x16xf32>
    %12 = arith.addf %10, %11 : vector<2x16xf32>
    %13 = vector.extract_strided_slice %0 {offsets = [0, 13], sizes = [2, 3], strides = [1, 1]} : vector<2x16xf32> to vector<2x3xf32>
    %14 = vector.extract_strided_slice %0 {offsets = [0, 0], sizes = [2, 13], strides = [1, 1]} : vector<2x16xf32> to vector<2x13xf32>
    %15 = tpu.concatenate %13, %14 in 1 : vector<2x3xf32>, vector<2x13xf32> -> vector<2x16xf32>
    %16 = vector.broadcast %1 : f32 to vector<2x16xf32>
    %17 = arith.mulf %16, %15 : vector<2x16xf32>
    %18 = arith.addf %12, %17 : vector<2x16xf32>
    %19 = vector.extract_strided_slice %0 {offsets = [0, 14], sizes = [2, 2], strides = [1, 1]} : vector<2x16xf32> to vector<2x2xf32>
    %20 = vector.extract_strided_slice %0 {offsets = [0, 0], sizes = [2, 14], strides = [1, 1]} : vector<2x16xf32> to vector<2x14xf32>
    %21 = tpu.concatenate %19, %20 in 1 : vector<2x2xf32>, vector<2x14xf32> -> vector<2x16xf32>
    %22 = vector.broadcast %2 : f32 to vector<2x16xf32>
    %23 = arith.mulf %22, %21 : vector<2x16xf32>
    %24 = arith.addf %18, %23 : vector<2x16xf32>
    %25 = vector.extract_strided_slice %0 {offsets = [0, 15], sizes = [2, 1], strides = [1, 1]} : vector<2x16xf32> to vector<2x1xf32>
    %26 = vector.extract_strided_slice %0 {offsets = [0, 0], sizes = [2, 15], strides = [1, 1]} : vector<2x16xf32> to vector<2x15xf32>
    %27 = tpu.concatenate %25, %26 in 1 : vector<2x1xf32>, vector<2x15xf32> -> vector<2x16xf32>
    %28 = vector.broadcast %3 : f32 to vector<2x16xf32>
    %29 = arith.mulf %28, %27 : vector<2x16xf32>
    %30 = arith.addf %24, %29 : vector<2x16xf32>
    %31 = vector.extract_strided_slice %0 {offsets = [0, 1], sizes = [2, 15], strides = [1, 1]} : vector<2x16xf32> to vector<2x15xf32>
    %32 = vector.extract_strided_slice %0 {offsets = [0, 0], sizes = [2, 1], strides = [1, 1]} : vector<2x16xf32> to vector<2x1xf32>
    %33 = tpu.concatenate %31, %32 in 1 : vector<2x15xf32>, vector<2x1xf32> -> vector<2x16xf32>
    %34 = vector.broadcast %5 : f32 to vector<2x16xf32>
    %35 = arith.mulf %34, %33 : vector<2x16xf32>
    %36 = arith.addf %30, %35 : vector<2x16xf32>
    %37 = vector.extract_strided_slice %0 {offsets = [0, 2], sizes = [2, 14], strides = [1, 1]} : vector<2x16xf32> to vector<2x14xf32>
    %38 = vector.extract_strided_slice %0 {offsets = [0, 0], sizes = [2, 2], strides = [1, 1]} : vector<2x16xf32> to vector<2x2xf32>
    %39 = tpu.concatenate %37, %38 in 1 : vector<2x14xf32>, vector<2x2xf32> -> vector<2x16xf32>
    %40 = vector.broadcast %6 : f32 to vector<2x16xf32>
    %41 = arith.mulf %40, %39 : vector<2x16xf32>
    %42 = arith.addf %36, %41 : vector<2x16xf32>
    %43 = vector.extract_strided_slice %0 {offsets = [0, 3], sizes = [2, 13], strides = [1, 1]} : vector<2x16xf32> to vector<2x13xf32>
    %44 = vector.extract_strided_slice %0 {offsets = [0, 0], sizes = [2, 3], strides = [1, 1]} : vector<2x16xf32> to vector<2x3xf32>
    %45 = tpu.concatenate %43, %44 in 1 : vector<2x13xf32>, vector<2x3xf32> -> vector<2x16xf32>
    %46 = vector.broadcast %7 : f32 to vector<2x16xf32>
    %47 = arith.mulf %46, %45 : vector<2x16xf32>
    %48 = arith.addf %42, %47 : vector<2x16xf32>
    %c0_3 = arith.constant 0 : index
    %c0_4 = arith.constant 0 : index
    %49 = vector.load %arg4[%c0_3, %c0_4] : memref<2x16xf32, #tpu.memory_space<vmem>>, vector<2x16xf32>
    tpu.vector_store %arg4[%c0_3, %c0_4], %48 {strides = array<i32>} : memref<2x16xf32, #tpu.memory_space<vmem>>, vector<2x16xf32>,
    %50 = vector.extract_strided_slice %0 {offsets = [0, 3], sizes = [2, 1], strides = [1, 1]} : vector<2x16xf32> to vector<2x1xf32>
    %51 = vector.broadcast %1 : f32 to vector<2x1xf32>
    %52 = arith.mulf %51, %50 : vector<2x1xf32>
    %53 = vector.broadcast %8 : f32 to vector<2x1xf32>
    %54 = arith.addf %53, %52 : vector<2x1xf32>
    %55 = vector.extract_strided_slice %0 {offsets = [0, 2], sizes = [2, 1], strides = [1, 1]} : vector<2x16xf32> to vector<2x1xf32>
    %56 = vector.broadcast %2 : f32 to vector<2x1xf32>
    %57 = arith.mulf %56, %55 : vector<2x1xf32>
    %58 = arith.addf %54, %57 : vector<2x1xf32>
    %59 = vector.extract_strided_slice %0 {offsets = [0, 1], sizes = [2, 1], strides = [1, 1]} : vector<2x16xf32> to vector<2x1xf32>
    %60 = vector.broadcast %3 : f32 to vector<2x1xf32>
    %61 = arith.mulf %60, %59 : vector<2x1xf32>
    %62 = arith.addf %58, %61 : vector<2x1xf32>
    %63 = vector.extract_strided_slice %0 {offsets = [0, 0], sizes = [2, 1], strides = [1, 1]} : vector<2x16xf32> to vector<2x1xf32>
    %64 = vector.broadcast %4 : f32 to vector<2x1xf32>
    %65 = arith.mulf %64, %63 : vector<2x1xf32>
    %66 = arith.addf %62, %65 : vector<2x1xf32>
    %67 = vector.extract_strided_slice %0 {offsets = [0, 1], sizes = [2, 1], strides = [1, 1]} : vector<2x16xf32> to vector<2x1xf32>
    %68 = vector.broadcast %5 : f32 to vector<2x1xf32>
    %69 = arith.mulf %68, %67 : vector<2x1xf32>
    %70 = arith.addf %66, %69 : vector<2x1xf32>
    %71 = vector.extract_strided_slice %0 {offsets = [0, 2], sizes = [2, 1], strides = [1, 1]} : vector<2x16xf32> to vector<2x1xf32>
    %72 = vector.broadcast %6 : f32 to vector<2x1xf32>
    %73 = arith.mulf %72, %71 : vector<2x1xf32>
    %74 = arith.addf %70, %73 : vector<2x1xf32>
    %75 = vector.extract_strided_slice %0 {offsets = [0, 3], sizes = [2, 1], strides = [1, 1]} : vector<2x16xf32> to vector<2x1xf32>
    %76 = vector.broadcast %7 : f32 to vector<2x1xf32>
    %77 = arith.mulf %76, %75 : vector<2x1xf32>
    %78 = arith.addf %74, %77 : vector<2x1xf32>
    %c0_5 = arith.constant 0 : index
    %c0_6 = arith.constant 0 : index
    %79 = vector.load %arg4[%c0_5, %c0_6] : memref<2x16xf32, #tpu.memory_space<vmem>>, vector<2x1xf32>
    tpu.vector_store %arg4[%c0_5, %c0_6], %78 {strides = array<i32>} : memref<2x16xf32, #tpu.memory_space<vmem>>, vector<2x1xf32>,
    %80 = vector.extract_strided_slice %0 {offsets = [0, 2], sizes = [2, 1], strides = [1, 1]} : vector<2x16xf32> to vector<2x1xf32>
    %81 = vector.broadcast %1 : f32 to vector<2x1xf32>
    %82 = arith.mulf %81, %80 : vector<2x1xf32>
    %83 = vector.broadcast %8 : f32 to vector<2x1xf32>
    %84 = arith.addf %83, %82 : vector<2x1xf32>
    %85 = vector.extract_strided_slice %0 {offsets = [0, 1], sizes = [2, 1], strides = [1, 1]} : vector<2x16xf32> to vector<2x1xf32>
    %86 = vector.broadcast %2 : f32 to vector<2x1xf32>
    %87 = arith.mulf %86, %85 : vector<2x1xf32>
    %88 = arith.addf %84, %87 : vector<2x1xf32>
    %89 = vector.extract_strided_slice %0 {offsets = [0, 0], sizes = [2, 1], strides = [1, 1]} : vector<2x16xf32> to vector<2x1xf32>
    %90 = vector.broadcast %3 : f32 to vector<2x1xf32>
    %91 = arith.mulf %90, %89 : vector<2x1xf32>
    %92 = arith.addf %88, %91 : vector<2x1xf32>
    %93 = vector.extract_strided_slice %0 {offsets = [0, 1], sizes = [2, 1], strides = [1, 1]} : vector<2x16xf32> to vector<2x1xf32>
    %94 = vector.broadcast %4 : f32 to vector<2x1xf32>
    %95 = arith.mulf %94, %93 : vector<2x1xf32>
    %96 = arith.addf %92, %95 : vector<2x1xf32>
    %97 = vector.extract_strided_slice %0 {offsets = [0, 2], sizes = [2, 1], strides = [1, 1]} : vector<2x16xf32> to vector<2x1xf32>
    %98 = vector.broadcast %5 : f32 to vector<2x1xf32>
    %99 = arith.mulf %98, %97 : vector<2x1xf32>
    %100 = arith.addf %96, %99 : vector<2x1xf32>
    %101 = vector.extract_strided_slice %0 {offsets = [0, 3], sizes = [2, 1], strides = [1, 1]} : vector<2x16xf32> to vector<2x1xf32>
    %102 = vector.broadcast %6 : f32 to vector<2x1xf32>
    %103 = arith.mulf %102, %101 : vector<2x1xf32>
    %104 = arith.addf %100, %103 : vector<2x1xf32>
    %105 = vector.extract_strided_slice %0 {offsets = [0, 4], sizes = [2, 1], strides = [1, 1]} : vector<2x16xf32> to vector<2x1xf32>
    %106 = vector.broadcast %7 : f32 to vector<2x1xf32>
    %107 = arith.mulf %106, %105 : vector<2x1xf32>
    %108 = arith.addf %104, %107 : vector<2x1xf32>
    %c0_7 = arith.constant 0 : index
    %c1_8 = arith.constant 1 : index
    %109 = vector.load %arg4[%c0_7, %c1_8] : memref<2x16xf32, #tpu.memory_space<vmem>>, vector<2x1xf32>
    tpu.vector_store %arg4[%c0_7, %c1_8], %108 {strides = array<i32>} : memref<2x16xf32, #tpu.memory_space<vmem>>, vector<2x1xf32>,
    %110 = vector.extract_strided_slice %0 {offsets = [0, 1], sizes = [2, 1], strides = [1, 1]} : vector<2x16xf32> to vector<2x1xf32>
    %111 = vector.broadcast %1 : f32 to vector<2x1xf32>
    %112 = arith.mulf %111, %110 : vector<2x1xf32>
    %113 = vector.broadcast %8 : f32 to vector<2x1xf32>
    %114 = arith.addf %113, %112 : vector<2x1xf32>
    %115 = vector.extract_strided_slice %0 {offsets = [0, 0], sizes = [2, 1], strides = [1, 1]} : vector<2x16xf32> to vector<2x1xf32>
    %116 = vector.broadcast %2 : f32 to vector<2x1xf32>
    %117 = arith.mulf %116, %115 : vector<2x1xf32>
    %118 = arith.addf %114, %117 : vector<2x1xf32>
    %119 = vector.extract_strided_slice %0 {offsets = [0, 1], sizes = [2, 1], strides = [1, 1]} : vector<2x16xf32> to vector<2x1xf32>
    %120 = vector.broadcast %3 : f32 to vector<2x1xf32>
    %121 = arith.mulf %120, %119 : vector<2x1xf32>
    %122 = arith.addf %118, %121 : vector<2x1xf32>
    %123 = vector.extract_strided_slice %0 {offsets = [0, 2], sizes = [2, 1], strides = [1, 1]} : vector<2x16xf32> to vector<2x1xf32>
    %124 = vector.broadcast %4 : f32 to vector<2x1xf32>
    %125 = arith.mulf %124, %123 : vector<2x1xf32>
    %126 = arith.addf %122, %125 : vector<2x1xf32>
    %127 = vector.extract_strided_slice %0 {offsets = [0, 3], sizes = [2, 1], strides = [1, 1]} : vector<2x16xf32> to vector<2x1xf32>
    %128 = vector.broadcast %5 : f32 to vector<2x1xf32>
    %129 = arith.mulf %128, %127 : vector<2x1xf32>
    %130 = arith.addf %126, %129 : vector<2x1xf32>
    %131 = vector.extract_strided_slice %0 {offsets = [0, 4], sizes = [2, 1], strides = [1, 1]} : vector<2x16xf32> to vector<2x1xf32>
    %132 = vector.broadcast %6 : f32 to vector<2x1xf32>
    %133 = arith.mulf %132, %131 : vector<2x1xf32>
    %134 = arith.addf %130, %133 : vector<2x1xf32>
    %135 = vector.extract_strided_slice %0 {offsets = [0, 5], sizes = [2, 1], strides = [1, 1]} : vector<2x16xf32> to vector<2x1xf32>
    %136 = vector.broadcast %7 : f32 to vector<2x1xf32>
    %137 = arith.mulf %136, %135 : vector<2x1xf32>
    %138 = arith.addf %134, %137 : vector<2x1xf32>
    %c0_9 = arith.constant 0 : index
    %c2_10 = arith.constant 2 : index
    %139 = vector.load %arg4[%c0_9, %c2_10] : memref<2x16xf32, #tpu.memory_space<vmem>>, vector<2x1xf32>
    tpu.vector_store %arg4[%c0_9, %c2_10], %138 {strides = array<i32>} : memref<2x16xf32, #tpu.memory_space<vmem>>, vector<2x1xf32>,
    %140 = vector.extract_strided_slice %0 {offsets = [0, 10], sizes = [2, 1], strides = [1, 1]} : vector<2x16xf32> to vector<2x1xf32>
    %141 = vector.broadcast %1 : f32 to vector<2x1xf32>
    %142 = arith.mulf %141, %140 : vector<2x1xf32>
    %143 = vector.broadcast %8 : f32 to vector<2x1xf32>
    %144 = arith.addf %143, %142 : vector<2x1xf32>
    %145 = vector.extract_strided_slice %0 {offsets = [0, 11], sizes = [2, 1], strides = [1, 1]} : vector<2x16xf32> to vector<2x1xf32>
    %146 = vector.broadcast %2 : f32 to vector<2x1xf32>
    %147 = arith.mulf %146, %145 : vector<2x1xf32>
    %148 = arith.addf %144, %147 : vector<2x1xf32>
    %149 = vector.extract_strided_slice %0 {offsets = [0, 12], sizes = [2, 1], strides = [1, 1]} : vector<2x16xf32> to vector<2x1xf32>
    %150 = vector.broadcast %3 : f32 to vector<2x1xf32>
    %151 = arith.mulf %150, %149 : vector<2x1xf32>
    %152 = arith.addf %148, %151 : vector<2x1xf32>
    %153 = vector.extract_strided_slice %0 {offsets = [0, 13], sizes = [2, 1], strides = [1, 1]} : vector<2x16xf32> to vector<2x1xf32>
    %154 = vector.broadcast %4 : f32 to vector<2x1xf32>
    %155 = arith.mulf %154, %153 : vector<2x1xf32>
    %156 = arith.addf %152, %155 : vector<2x1xf32>
    %157 = vector.extract_strided_slice %0 {offsets = [0, 14], sizes = [2, 1], strides = [1, 1]} : vector<2x16xf32> to vector<2x1xf32>
    %158 = vector.broadcast %5 : f32 to vector<2x1xf32>
    %159 = arith.mulf %158, %157 : vector<2x1xf32>
    %160 = arith.addf %156, %159 : vector<2x1xf32>
    %161 = vector.extract_strided_slice %0 {offsets = [0, 15], sizes = [2, 1], strides = [1, 1]} : vector<2x16xf32> to vector<2x1xf32>
    %162 = vector.broadcast %6 : f32 to vector<2x1xf32>
    %163 = arith.mulf %162, %161 : vector<2x1xf32>
    %164 = arith.addf %160, %163 : vector<2x1xf32>
    %165 = vector.extract_strided_slice %0 {offsets = [0, 14], sizes = [2, 1], strides = [1, 1]} : vector<2x16xf32> to vector<2x1xf32>
    %166 = vector.broadcast %7 : f32 to vector<2x1xf32>
    %167 = arith.mulf %166, %165 : vector<2x1xf32>
    %168 = arith.addf %164, %167 : vector<2x1xf32>
    %c0_11 = arith.constant 0 : index
    %c13 = arith.constant 13 : index
    %169 = vector.load %arg4[%c0_11, %c13] : memref<2x16xf32, #tpu.memory_space<vmem>>, vector<2x1xf32>
    tpu.vector_store %arg4[%c0_11, %c13], %168 {strides = array<i32>} : memref<2x16xf32, #tpu.memory_space<vmem>>, vector<2x1xf32>,
    %170 = vector.extract_strided_slice %0 {offsets = [0, 11], sizes = [2, 1], strides = [1, 1]} : vector<2x16xf32> to vector<2x1xf32>
    %171 = vector.broadcast %1 : f32 to vector<2x1xf32>
    %172 = arith.mulf %171, %170 : vector<2x1xf32>
    %173 = vector.broadcast %8 : f32 to vector<2x1xf32>
    %174 = arith.addf %173, %172 : vector<2x1xf32>
    %175 = vector.extract_strided_slice %0 {offsets = [0, 12], sizes = [2, 1], strides = [1, 1]} : vector<2x16xf32> to vector<2x1xf32>
    %176 = vector.broadcast %2 : f32 to vector<2x1xf32>
    %177 = arith.mulf %176, %175 : vector<2x1xf32>
    %178 = arith.addf %174, %177 : vector<2x1xf32>
    %179 = vector.extract_strided_slice %0 {offsets = [0, 13], sizes = [2, 1], strides = [1, 1]} : vector<2x16xf32> to vector<2x1xf32>
    %180 = vector.broadcast %3 : f32 to vector<2x1xf32>
    %181 = arith.mulf %180, %179 : vector<2x1xf32>
    %182 = arith.addf %178, %181 : vector<2x1xf32>
    %183 = vector.extract_strided_slice %0 {offsets = [0, 14], sizes = [2, 1], strides = [1, 1]} : vector<2x16xf32> to vector<2x1xf32>
    %184 = vector.broadcast %4 : f32 to vector<2x1xf32>
    %185 = arith.mulf %184, %183 : vector<2x1xf32>
    %186 = arith.addf %182, %185 : vector<2x1xf32>
    %187 = vector.extract_strided_slice %0 {offsets = [0, 15], sizes = [2, 1], strides = [1, 1]} : vector<2x16xf32> to vector<2x1xf32>
    %188 = vector.broadcast %5 : f32 to vector<2x1xf32>
    %189 = arith.mulf %188, %187 : vector<2x1xf32>
    %190 = arith.addf %186, %189 : vector<2x1xf32>
    %191 = vector.extract_strided_slice %0 {offsets = [0, 14], sizes = [2, 1], strides = [1, 1]} : vector<2x16xf32> to vector<2x1xf32>
    %192 = vector.broadcast %6 : f32 to vector<2x1xf32>
    %193 = arith.mulf %192, %191 : vector<2x1xf32>
    %194 = arith.addf %190, %193 : vector<2x1xf32>
    %195 = vector.extract_strided_slice %0 {offsets = [0, 13], sizes = [2, 1], strides = [1, 1]} : vector<2x16xf32> to vector<2x1xf32>
    %196 = vector.broadcast %7 : f32 to vector<2x1xf32>
    %197 = arith.mulf %196, %195 : vector<2x1xf32>
    %198 = arith.addf %194, %197 : vector<2x1xf32>
    %c0_12 = arith.constant 0 : index
    %c14 = arith.constant 14 : index
    %199 = vector.load %arg4[%c0_12, %c14] : memref<2x16xf32, #tpu.memory_space<vmem>>, vector<2x1xf32>
    tpu.vector_store %arg4[%c0_12, %c14], %198 {strides = array<i32>} : memref<2x16xf32, #tpu.memory_space<vmem>>, vector<2x1xf32>,
    %200 = vector.extract_strided_slice %0 {offsets = [0, 12], sizes = [2, 1], strides = [1, 1]} : vector<2x16xf32> to vector<2x1xf32>
    %201 = vector.broadcast %1 : f32 to vector<2x1xf32>
    %202 = arith.mulf %201, %200 : vector<2x1xf32>
    %203 = vector.broadcast %8 : f32 to vector<2x1xf32>
    %204 = arith.addf %203, %202 : vector<2x1xf32>
    %205 = vector.extract_strided_slice %0 {offsets = [0, 13], sizes = [2, 1], strides = [1, 1]} : vector<2x16xf32> to vector<2x1xf32>
    %206 = vector.broadcast %2 : f32 to vector<2x1xf32>
    %207 = arith.mulf %206, %205 : vector<2x1xf32>
    %208 = arith.addf %204, %207 : vector<2x1xf32>
    %209 = vector.extract_strided_slice %0 {offsets = [0, 14], sizes = [2, 1], strides = [1, 1]} : vector<2x16xf32> to vector<2x1xf32>
    %210 = vector.broadcast %3 : f32 to vector<2x1xf32>
    %211 = arith.mulf %210, %209 : vector<2x1xf32>
    %212 = arith.addf %208, %211 : vector<2x1xf32>
    %213 = vector.extract_strided_slice %0 {offsets = [0, 15], sizes = [2, 1], strides = [1, 1]} : vector<2x16xf32> to vector<2x1xf32>
    %214 = vector.broadcast %4 : f32 to vector<2x1xf32>
    %215 = arith.mulf %214, %213 : vector<2x1xf32>
    %216 = arith.addf %212, %215 : vector<2x1xf32>
    %217 = vector.extract_strided_slice %0 {offsets = [0, 14], sizes = [2, 1], strides = [1, 1]} : vector<2x16xf32> to vector<2x1xf32>
    %218 = vector.broadcast %5 : f32 to vector<2x1xf32>
    %219 = arith.mulf %218, %217 : vector<2x1xf32>
    %220 = arith.addf %216, %219 : vector<2x1xf32>
    %221 = vector.extract_strided_slice %0 {offsets = [0, 13], sizes = [2, 1], strides = [1, 1]} : vector<2x16xf32> to vector<2x1xf32>
    %222 = vector.broadcast %6 : f32 to vector<2x1xf32>
    %223 = arith.mulf %222, %221 : vector<2x1xf32>
    %224 = arith.addf %220, %223 : vector<2x1xf32>
    %225 = vector.extract_strided_slice %0 {offsets = [0, 12], sizes = [2, 1], strides = [1, 1]} : vector<2x16xf32> to vector<2x1xf32>
    %226 = vector.broadcast %7 : f32 to vector<2x1xf32>
    %227 = arith.mulf %226, %225 : vector<2x1xf32>
    %228 = arith.addf %224, %227 : vector<2x1xf32>
    %c0_13 = arith.constant 0 : index
    %c15 = arith.constant 15 : index
    %229 = vector.load %arg4[%c0_13, %c15] : memref<2x16xf32, #tpu.memory_space<vmem>>, vector<2x1xf32>
    tpu.vector_store %arg4[%c0_13, %c15], %228 {strides = array<i32>} : memref<2x16xf32, #tpu.memory_space<vmem>>, vector<2x1xf32>,
    return
  }
  func.func @transform_0(%arg0: i32) -> (i32, i32) {
    %c0_i32 = arith.constant 0 : i32
    %c0_i32_0 = arith.constant 0 : i32
    return %arg0, %c0_i32 : i32, i32
  }
  func.func @transform_1(%arg0: i32) -> i32 {
    %c0_i32 = arith.constant 0 : i32
    %c0_i32_0 = arith.constant 0 : i32
    return %c0_i32 : i32
  }
  func.func @transform_2(%arg0: i32) -> i32 {
    %c0_i32 = arith.constant 0 : i32
    %c0_i32_0 = arith.constant 0 : i32
    return %c0_i32 : i32
  }
  func.func @transform_3(%arg0: i32) -> (i32, i32) {
    %c0_i32 = arith.constant 0 : i32
    %c0_i32_0 = arith.constant 0 : i32
    return %arg0, %c0_i32 : i32, i32
  }
}

</mosaic_0001>

<bundles_post_ra>
// kernel: tpu_custom_call.1
= control target key start
LH: loop header
LB: loop body
LE: loop exit
PB: predicated region body
PF: predicated region fallthrough
CT: control target
= control target key end

     0   :  { %9 = vsyncpa [#allocation5], 0  ;;  %s446_s0 = inlined_call_operand.vmem [shape: f32[2,16], index: 0, kind: input, shape index: {}]   ;;  %s447_s1 = inlined_call_operand.vmem [shape: f32[7], index: 1, kind: input, shape index: {}]   ;;  %s448_s2 = inlined_call_operand.<no memory space> [shape: f32[1], index: 2, kind: input, shape index: {}]   ;;  %s449_s3 = inlined_call_operand.hbm [shape: f32[2,16], index: 3, kind: output, shape index: {}]  }
   0x1   :  { %10 = vsyncpa [#allocation4], 0  ;;  %s19_s14 = sshll.u32 %s447_s1, 4  ;;  %s20_s14 = int_to_ptr.vmem [resolvable:$true] %s19_s14 }
   0x2   :  { %s274_s15 = scalar_lea.vmem %s20_s14, 16  ;;  %p279_p1 = scmp.lt.s32.totalorder %s20_s14, %s20_s14 }
   0x3   :  { %p275_p0 = scmp.ne.s32.totalorder %s20_s14, %s274_s15  ;;  %p280_p2 = scmp.lt.s32.totalorder %s274_s15, %s274_s15 }
   0x5   :  { %p281_p3 = por %p280_p2, %p279_p1 }
   0x7   :  { %p282_p4 = pnand %p281_p3, %p275_p0 }
   0x9   :  { %285 = shalt.err (!%p282_p4)
}
   0xa   :  { %s310_s16 = smov [#allocation3]  }
   0xb   :  { %22 = dma.vmem_to_smem %s20_s14, 16, %s310_s16, [#allocation5]  }
   0xc   :  { %306 = dma.done.wait [#allocation5], 16  }
   0xd   :  { %307 = vsyncadd [#allocation5], 4294967280 }
   0xe   :  { %28 = sfence }
   0xf   :  { %s349_s17 = sld [smem:[#allocation3 + $0x1]]  ;;  %v29_v0 = vld [vmem:[%s446_s0] sm:$0x3]  ;;  %s311_s22 = smov 127   ;;  %v40_v15 = vstv %s448_s2  ;;  %vm49_vm0 = vcmask 23552   ;;  %vm60_vm1 = vcmask 15360  }
  0x10   :  { %s351_s18 = sld [smem:[#allocation3 + $0x2]]  ;;  %s312_s23 = smov 1   ;;  %vm71_vm2 = vcmask 7168   ;;  %vm82_vm3 = vcmask 121856   ;;  %vm93_vm4 = vcmask 113664   ;;  %vm104_vm5 = vcmask 105472  }
  0x11   :  { %s254_s1 = sld [smem:[#allocation3 + $0x3]]  ;;  %s313_s24 = smov 2   ;;  %vm109_vm6 = vcmask 123904   ;;  %vm148_vm7 = vcmask 1024   ;;  %vm168_vm8 = vcmask 9224   ;;  %vm191_vm9 = vcmask 17424  }
  0x12   :  { %s357_s21 = sld [smem:[#allocation3 + $0x4]]  ;;  %s314_s25 = smov 3   ;;  %vm218_vm10 = vcmask 107624   ;;  %vm226_vm11 = vcmask 115824   ;;  %vm235_vm12 = vcmask 124024  }
  0x13   :  { %s370_s0 = sld [smem:[#allocation3 + $0x5]]  ;;  %s315_s26 = smov 126  }
  0x14   :  { %s392_s27 = sld [smem:[#allocation3 + $0x6]]  ;;  %s316_s28 = smov 125  }
  0x15   :  { %v62_v1 = vstv %s349_s17  ;;  %s317_s29 = smov 124   ;;  %s318_s30 = smov 123  }
  0x16   :  { %v113_v2 = vmul.f32 %v62_v1, %v29_v0  ;;  %v73_v3 = vstv %s351_s18  ;;  %s319_s4 = smov 115   ;;  %s320_s5 = smov 114  }
  0x17   :  { %v38_v4 = vstv %s254_s1  ;;  %v366_v5 = vmul.f32 %v73_v3, %v29_v0  ;;  %s321_s6 = smov 113   ;;  %s322_s7 = smov 15  }
  0x18   :  { %193 = vrot.lane.b32.xlu1 %v113_v2, %s311_s22  ;;  %115 = vrot.lane.b32.xlu0 %v113_v2, %s312_s23  ;;  %v368_v6 = vmul.f32 %v38_v4, %v29_v0  ;;  %v84_v7 = vstv %s357_s21  ;;  %s323_s8 = smov 14   ;;  %s324_s9 = smov 13  }
  0x19   :  { %v383_v8 = vmul.f32 %v84_v7, %v29_v0  ;;  %v95_v9 = vstv %s370_s0  ;;  %s416_s10 = sld [smem:[#allocation3]]  ;;  %s325_s2 = smov [#allocation6]  }
  0x1a   :  { %v136_v10 = vmul.f32 %v95_v9, %v29_v0  ;;  %v106_v11 = vstv %s392_s27  ;;  %v41_v59 = vadd.f32 %v40_v15, %v368_v6  ;;  %s243_s13 = sshll.u32 %s325_s2, 4  ;;  %s244_s13 = int_to_ptr.vmem [resolvable:$true] %s243_s13 }
  0x1b   :  { %v405_v12 = vmul.f32 %v106_v11, %v29_v0  ;;  %s286_s14 = scalar_lea.vmem %s244_s13, 32  ;;  %p291_p6 = scmp.lt.s32.totalorder %s244_s13, %s244_s13 }
  0x1c   :  { %121 = vrot.lane.b32.xlu0 %v366_v5, %s313_s24  ;;  %126 = vrot.lane.b32.xlu1 %v368_v6, %s314_s25  ;;  %p287_p5 = scmp.ne.s32.totalorder %s244_s13, %s286_s14  ;;  %p292_p7 = scmp.lt.s32.totalorder %s286_s14, %s286_s14 }
  0x1e   :  { %p293_p8 = por %p292_p7, %p291_p6 }
  0x1f   :  { %v51_v13 = vstv %s416_s10 }
  0x20   :  { %150 = vrot.lane.b32.xlu0 %v368_v6, %s312_s23  ;;  %197 = vrot.lane.b32.xlu1 %v366_v5, %s315_s26  ;;  %v111_v14 = vmul.f32 %v51_v13, %v29_v0  ;;  %p294_p9 = pnand %p293_p8, %p287_p5 }
  0x22   :  { %v112_v18 = vadd.f32 %v111_v14, %v40_v15 }
  0x24   :  { %132 = vrot.lane.b32.xlu0 %v383_v8, %s313_s24  ;;  %171 = vrot.lane.b32.xlu1 %v368_v6, %s311_s22 }
  0x28   :  { %201 = vrot.lane.b32.xlu0 %v368_v6, %s316_s28  ;;  %138 = vrot.lane.b32.xlu1 %v136_v10, %s312_s23 }
  0x2c   :  { %175 = vrot.lane.b32.xlu0 %v383_v8, %s315_s26  ;;  %155 = vrot.lane.b32.xlu1 %v136_v10, %s311_s22 }
  0x30   :  { %205 = vrot.lane.b32.xlu0 %v383_v8, %s317_s29  ;;  %179 = vrot.lane.b32.xlu1 %v136_v10, %s316_s28 }
  0x34   :  { %160 = vrot.lane.b32.xlu0 %v405_v12, %s315_s26  ;;  %209 = vrot.lane.b32.xlu1 %v136_v10, %s318_s30 }
  0x38   :  { %183 = vrot.lane.b32.xlu0 %v405_v12, %s317_s29  ;;  %43 = vrot.lane.b32.xlu1 %v29_v0, %s319_s4 }
  0x3c   :  { %46 = vrot.lane.b32.xlu0 %v29_v0, %s314_s25  ;;  %54 = vrot.lane.b32.xlu1 %v29_v0, %s320_s5 }
  0x40   :  { %57 = vrot.lane.b32.xlu0 %v29_v0, %s313_s24  ;;  %65 = vrot.lane.b32.xlu1 %v29_v0, %s321_s6 }
  0x44   :  { %68 = vrot.lane.b32.xlu0 %v29_v0, %s312_s23  ;;  %76 = vrot.lane.b32.xlu1 %v29_v0, %s311_s22 }
  0x48   :  { %79 = vrot.lane.b32.xlu0 %v29_v0, %s322_s7  ;;  %87 = vrot.lane.b32.xlu1 %v29_v0, %s315_s26 }
  0x4c   :  { %90 = vrot.lane.b32.xlu0 %v29_v0, %s323_s8  ;;  %98 = vrot.lane.b32.xlu1 %v29_v0, %s316_s28 }
  0x50   :  { %101 = vrot.lane.b32.xlu0 %v29_v0, %s324_s9 }
  0x8a   :  { %v194_v16 = vpop.permute.xlu1 %193  ;;  %v116_v17 = vpop.permute.xlu0 %115 }
  0x8b   :  { %v118_v21 = vadd.f32 %v116_v17, %v112_v18  ;;  %v196_v36 = vadd.f32 %v194_v16, %v112_v18 }
  0x8d   :  { %v170_v41 = vadd.f32 %v366_v5, %v118_v21 }
  0x8e   :  { %v122_v19 = vpop.permute.xlu0 %121  ;;  %v127_v20 = vpop.permute.xlu1 %126 }
  0x8f   :  { %v124_v24 = vadd.f32 %v122_v19, %v118_v21 }
  0x91   :  { %v129_v27 = vadd.f32 %v127_v20, %v124_v24 }
  0x92   :  { %v151_v22 = vpop.permute.xlu0 %150  ;;  %v198_v23 = vpop.permute.xlu1 %197 }
  0x93   :  { %v153_v35 = vadd.f32 %v151_v22, %v124_v24  ;;  %v200_v40 = vadd.f32 %v198_v23, %v196_v36 }
  0x95   :  { %v154_v39 = vadd.f32 %v153_v35, %v383_v8 }
  0x96   :  { %v133_v25 = vpop.permute.xlu0 %132  ;;  %v172_v26 = vpop.permute.xlu1 %171 }
  0x97   :  { %v135_v28 = vadd.f32 %v133_v25, %v129_v27  ;;  %v174_v42 = vadd.f32 %v172_v26, %v170_v41 }
  0x9a   :  { %v202_v29 = vpop.permute.xlu0 %201  ;;  %v139_v30 = vpop.permute.xlu1 %138 }
  0x9b   :  { %v141_v31 = vadd.f32 %v139_v30, %v135_v28  ;;  %v204_v43 = vadd.f32 %v202_v29, %v200_v40 }
  0x9d   :  { %v143_v32 = vadd.f32 %v405_v12, %v141_v31 }
  0x9e   :  { %v176_v33 = vpop.permute.xlu0 %175  ;;  %v156_v34 = vpop.permute.xlu1 %155 }
  0x9f   :  { %145 = vrot.lane.b32.xlu1 %v143_v32, %s316_s28  ;;  %v158_v44 = vadd.f32 %v156_v34, %v154_v39  ;;  %v178_v47 = vadd.f32 %v176_v33, %v174_v42  ;;  %v228_v48 = vadd.f32 %v204_v43, %v176_v33 }
  0xa1   :  { %v229_v55 = vadd.f32 %v228_v48, %v156_v34 }
  0xa2   :  { %v206_v37 = vpop.permute.xlu0 %205  ;;  %v180_v38 = vpop.permute.xlu1 %179 }
  0xa3   :  { %v208_v49 = vadd.f32 %v206_v37, %v204_v43  ;;  %v182_v51 = vadd.f32 %v180_v38, %v178_v47  ;;  %v230_v62 = vadd.f32 %v229_v55, %v405_v12 }
  0xa5   :  { %v220_v56 = vadd.f32 %v208_v49, %v180_v38 }
  0xa6   :  { %v161_v45 = vpop.permute.xlu0 %160  ;;  %v210_v46 = vpop.permute.xlu1 %209 }
  0xa7   :  { %v163_v50 = vadd.f32 %v161_v45, %v158_v44  ;;  %v212_v52 = vadd.f32 %v210_v46, %v208_v49  ;;  %v221_v63 = vadd.f32 %v220_v56, %v161_v45 }
  0xa9   :  { %165 = vrot.lane.b32.xlu0 %v163_v50, %s311_s22 }
  0xaa   :  { %v184_v53 = vpop.permute.xlu0 %183  ;;  %v44_v54 = vpop.permute.xlu1 %43 }
  0xab   :  { %v186_v57 = vadd.f32 %v184_v53, %v182_v51  ;;  %v213_v58 = vadd.f32 %v212_v52, %v184_v53 }
  0xad   :  { %188 = vrot.lane.b32.xlu1 %v186_v57, %s312_s23  ;;  %215 = vrot.lane.b32.xlu0 %v213_v58, %s314_s25 }
  0xae   :  { %v47_v60 = vpop.permute.xlu0 %46  ;;  %v55_v61 = vpop.permute.xlu1 %54 }
  0xaf   :  { %v50_v0 = vsel %vm49_vm0, %v44_v54, %v47_v60 }
  0xb0   :  { %v52_v2 = vmul.f32 %v51_v13, %v50_v0 }
  0xb1   :  { %223 = vrot.lane.b32.xlu1 %v221_v63, %s314_s25  ;;  %232 = vrot.lane.b32.xlu0 %v230_v62, %s314_s25 }
  0xb2   :  { %v53_v4 = vadd.f32 %v52_v2, %v41_v59  ;;  %v58_v5 = vpop.permute.xlu0 %57  ;;  %v66_v8 = vpop.permute.xlu1 %65 }
  0xb3   :  { %v61_v10 = vsel %vm60_vm1, %v55_v61, %v58_v5 }
  0xb4   :  { %v63_v6 = vmul.f32 %v62_v1, %v61_v10 }
  0xb6   :  { %v64_v14 = vadd.f32 %v63_v6, %v53_v4  ;;  %v69_v12 = vpop.permute.xlu0 %68  ;;  %v77_v15 = vpop.permute.xlu1 %76 }
  0xb7   :  { %v72_v16 = vsel %vm71_vm2, %v66_v8, %v69_v12 }
  0xb8   :  { %v74_v13 = vmul.f32 %v73_v3, %v72_v16 }
  0xba   :  { %v75_v17 = vadd.f32 %v74_v13, %v64_v14  ;;  %v80_v18 = vpop.permute.xlu0 %79  ;;  %v88_v19 = vpop.permute.xlu1 %87 }
  0xbb   :  { %v83_v20 = vsel %vm82_vm3, %v77_v15, %v80_v18 }
  0xbc   :  { %v85_v21 = vmul.f32 %v84_v7, %v83_v20 }
  0xbe   :  { %v86_v22 = vadd.f32 %v85_v21, %v75_v17  ;;  %v91_v23 = vpop.permute.xlu0 %90  ;;  %v99_v25 = vpop.permute.xlu1 %98 }
  0xbf   :  { %v94_v1 = vsel %vm93_vm4, %v88_v19, %v91_v23 }
  0xc0   :  { %v96_v24 = vmul.f32 %v95_v9, %v94_v1 }
  0xc2   :  { %v97_v26 = vadd.f32 %v96_v24, %v86_v22  ;;  %v102_v27 = vpop.permute.xlu0 %101 }
  0xc3   :  { %v105_v28 = vsel %vm104_vm5, %v99_v25, %v102_v27 }
  0xc4   :  { %v107_v3 = vmul.f32 %v106_v11, %v105_v28 }
  0xc6   :  { %v108_v29 = vadd.f32 %v107_v3, %v97_v26 }
  0xc8   :  { %110 = vst.msk [vmem:[#allocation6] sm:$0x3] %vm109_vm6, %v108_v29 }
 0x111   :  { %v146_v30 = vpop.permute.xlu1 %145 }
 0x112   :  { %149 = vst.msk [vmem:[#allocation6] sm:$0x3] %vm148_vm7, %v146_v30 }
 0x11b   :  { %v166_v7 = vpop.permute.xlu0 %165 }
 0x11c   :  { %169 = vst.msk [vmem:[#allocation6] sm:$0x3] %vm168_vm8, %v166_v7 }
 0x11f   :  { %v216_v31 = vpop.permute.xlu0 %215  ;;  %v189_v9 = vpop.permute.xlu1 %188 }
 0x120   :  { %192 = vst.msk [vmem:[#allocation6] sm:$0x3] %vm191_vm9, %v189_v9 }
 0x121   :  { %219 = vst.msk [vmem:[#allocation6] sm:$0x3] %vm218_vm10, %v216_v31 }
 0x123   :  { %v233_v11 = vpop.permute.xlu0 %232  ;;  %v224_v32 = vpop.permute.xlu1 %223 }
 0x124   :  { %227 = vst.msk [vmem:[#allocation6] sm:$0x3] %vm226_vm11, %v224_v32 }
 0x125   :  { %236 = vst.msk [vmem:[#allocation6] sm:$0x3] %vm235_vm12, %v233_v11 }
 0x126   :  { %297 = shalt.err (!%p294_p9)
}
 0x127   :  { %246 = dma.vmem_to_hbm [thread:$0]  %s244_s13, 32, %s449_s3, [#allocation4]  }
 0x128   :  { %308 = dma.done.wait [#allocation4], 32  }
 0x129   :  { %309 = vsyncadd [#allocation4], 4294967264 }
 0x12a   :  { %250 = vsyncpa [#allocation4], 1 }
 0x12b   :  { %251 = vsyncpa [#allocation5], 1 }

</bundles_post_ra>
